<compile_context>
chip_gen: v5e
topology: v5e:2x2
jax: 0.10.0
libtpu: 0.0.40
codegen_flags: <defaults>
</compile_context>

<pallas_src>
import math

import jax
import jax.numpy as jnp
import numpy as np
from jax import lax
from jax.experimental import pallas as pl
from jax.experimental.pallas import tpu as pltpu

# ----------------------------- problem sizes --------------------------------
B = 2                 # batch
C, H, W = 3, 16, 16   # image NCHW
N_CLS = 3             # number of classes
N_DESC = 4            # GPT descriptors per class (uniform in this synthetic setup)
N_CTX = 4             # learnable context tokens
SEQ = 8               # text sequence length = 1 (SOS) + N_CTX + suffix
DIM = 32              # ctx_dim == embed dim (ln_final width, text_projection out)
FLAT = C * H * W      # 768


# ============================================================================
# Single fused kernel:
#   image patch-embed matmul (clip_model.visual stand-in, bf16 MXU / f32 acc)
#   + TextEncoder head (ln_final + text_projection on EOT rows)
#   + MergePrompt attention (per-class softmax via precomputed additive mask)
#   + L2 normalization of both feature sets
#   + exp(logit_scale) * image @ text^T scoring
# ============================================================================
def _fused_clip_kernel(ls_ref, x_ref, wimg_ref, xeot_ref, lnw_ref, lnb_ref,
                       proj_ref, tok_ref, wqk_ref, mask_ref, o_ref):
    # ---- image encoder stand-in: single-block (B, F) @ (F, D) bf16 matmul ----
    # TODO(synk): clip_model.visual (pretrained ViT/ResNet) is external; this
    # stand-in is a single linear patch embedding over the flattened image.
    img = jnp.dot(x_ref[...], wimg_ref[...],
                  preferred_element_type=jnp.float32)              # (B, D) f32

    # ---- TextEncoder head: ln_final + text_projection on EOT rows (f32) ----
    xe = xeot_ref[...]                                             # (Nt, D)
    mean = jnp.mean(xe, axis=-1, keepdims=True)
    var = jnp.mean(jnp.square(xe - mean), axis=-1, keepdims=True)
    xn = (xe - mean) * lax.rsqrt(var + 1e-5)
    xn = xn * lnw_ref[...] + lnb_ref[...]
    txt = jnp.dot(xn, proj_ref[...],
                  preferred_element_type=jnp.float32)              # (Nt, D)

    # ---- MergePrompt attention ----
    # wqk_ref already holds (Wq^T @ Wk) * dim**-0.5 (folded in precompute), so
    # scores = tok @ wqk @ txt^T needs only two MXU passes here.
    tok = tok_ref[...]                                             # (Nc, D)
    qm = jnp.dot(tok, wqk_ref[...],
                 preferred_element_type=jnp.float32)               # (Nc, D)
    scores = lax.dot_general(qm, txt, (((1,), (1,)), ((), ())),
                             preferred_element_type=jnp.float32)
    # each class attends only to its own descriptors: precomputed -1e30 bias
    scores = scores + mask_ref[...]                                # (Nc, Nt)

    m = jnp.max(scores, axis=-1, keepdims=True)
    e = jnp.exp(scores - m)
    attn = e * pl.reciprocal(jnp.sum(e, axis=-1, keepdims=True), approx=True)

    # out = query + attn @ value  (value == text features)
    grouped = tok + jnp.dot(attn, txt, preferred_element_type=jnp.float32)

    # ---- L2 normalize + scaled cosine logits ----
    # (no eps, matching the PyTorch `x / x.norm()` semantics)
    g_n = grouped * lax.rsqrt(jnp.sum(grouped * grouped, axis=-1, keepdims=True))
    i_n = img * lax.rsqrt(jnp.sum(img * img, axis=-1, keepdims=True))

    logits = lax.dot_general(i_n, g_n, (((1,), (1,)), ((), ())),
                             preferred_element_type=jnp.float32)   # (B, Nc)
    o_ref[...] = (ls_ref[0] * logits).astype(o_ref.dtype)          # exp() folded


def fused_clip_call(d, x_flat):
    b = x_flat.shape[0]
    n_cls = d["token"].shape[0]
    vmem = pl.BlockSpec(memory_space=pltpu.MemorySpace.VMEM)
    smem = pl.BlockSpec(memory_space=pltpu.MemorySpace.SMEM)
    return pl.pallas_call(
        _fused_clip_kernel,
        out_shape=jax.ShapeDtypeStruct((b, n_cls), jnp.float32),
        in_specs=[smem, vmem, vmem, vmem, vmem, vmem, vmem, vmem, vmem, vmem],
        out_specs=vmem,
    )(d["ls_exp"], x_flat, d["w_img"], d["x_eot"], d["ln_w"], d["ln_b"],
      d["text_proj"], d["token"], d["w_qk"], d["mask"])


# ============================================================================
# Parameter construction (deterministic, synthetic)
# ============================================================================
def make_params(key):
    ks = jax.random.split(key, 10)
    xavier_std = math.sqrt(2.0 / (DIM + DIM))
    n_suffix = SEQ - 1 - N_CTX
    params = dict(
        # PromptLearner
        ctx=0.02 * jax.random.normal(ks[0], (N_CTX, DIM), jnp.float32),
        prefix=0.02 * jax.random.normal(ks[1], (N_CLS, N_DESC, 1, DIM),
                                        jnp.float32),
        suffix=0.02 * jax.random.normal(ks[2], (N_CLS, N_DESC, n_suffix, DIM),
                                        jnp.float32),
        # TextEncoder
        pos_emb=0.01 * jax.random.normal(ks[3], (SEQ, DIM), jnp.float32),
        ln_w=jnp.ones((DIM,), jnp.float32),
        ln_b=jnp.zeros((DIM,), jnp.float32),
        text_proj=(DIM ** -0.5) * jax.random.normal(ks[4], (DIM, DIM),
                                                    jnp.float32),
        # CustomCLIP
        logit_scale=jnp.float32(math.log(1.0 / 0.07)),
        token=0.02 * jax.random.normal(ks[5], (N_CLS, DIM), jnp.float32),
        wq=xavier_std * jax.random.normal(ks[6], (DIM, DIM), jnp.float32),
        wk=xavier_std * jax.random.normal(ks[7], (DIM, DIM), jnp.float32),
        # image-encoder stand-in (stored bf16: halves the dominant weight DMA,
        # MXU takes bf16 inputs with f32 accumulate on all TPU generations)
        w_img=((FLAT ** -0.5) * jax.random.normal(ks[8], (FLAT, DIM),
                                                  jnp.float32)
               ).astype(jnp.bfloat16),
    )
    # synthetic tokenized prompts: EOT token (largest id) at 1+N_CTX+name_len
    tok = jax.random.randint(ks[9], (N_CLS, N_DESC, SEQ), 1, 400, jnp.int32)
    name_len = (np.arange(N_DESC) % 2) + 1                    # 1 or 2
    eot_pos = 1 + N_CTX + name_len                            # 6 or 7 (< SEQ)
    eot_pos = np.broadcast_to(eot_pos, (N_CLS, N_DESC))
    one_hot = jax.nn.one_hot(jnp.asarray(eot_pos), SEQ, dtype=jnp.int32)
    params["tokenized"] = jnp.where(one_hot > 0, 49407, tok)
    return params


# ============================================================================
# One-time precompute of every image-independent operand the kernel needs.
# Runs once (outside the per-forward path).
# ============================================================================
def precompute(p):
    # PromptLearner + identity-transformer TextEncoder front-end reduced to
    # the EOT rows only: with class_token_position == 'end' the EOT position
    # (1 + n_ctx + name_len) always falls inside the suffix embeddings, so
    # x_eot = suffix[eot - (1 + n_ctx)] + pos_emb[eot].
    # TODO(synk): clip_model.transformer (pretrained stack) is external; the
    # identity stand-in makes this EOT-only shortcut exact. A real transformer
    # mixes all positions and would require the full prompt tensor again.
    eot_idx = jnp.argmax(p["tokenized"], axis=-1)               # (C, Nd)
    c_i = jnp.arange(N_CLS)[:, None]
    d_i = jnp.arange(N_DESC)[None, :]
    x_eot = (p["suffix"][c_i, d_i, eot_idx - (1 + N_CTX)]
             + p["pos_emb"][eot_idx])                           # (C, Nd, D)

    # Fold the MergePrompt q/k projections AND the attention scale:
    # q @ k^T * scale == tok @ ((Wq^T Wk) * scale) @ txt^T
    w_qk = (p["wq"].T @ p["wk"]) * (DIM ** -0.5)                # (D, D)

    # Per-class descriptor mask as an additive bias (0 / -1e30).
    n_total = N_CLS * N_DESC
    row = np.arange(N_CLS)[:, None]
    col = np.arange(n_total)[None, :]
    mask = np.where((col // N_DESC) == row, 0.0, -1e30).astype(np.float32)

    return dict(
        ls_exp=jnp.exp(p["logit_scale"]).reshape(1),            # 1-D SMEM scalar
        w_img=p["w_img"],                                       # bf16 (F, D)
        x_eot=x_eot.reshape(n_total, DIM).astype(jnp.float32),
        ln_w=p["ln_w"].reshape(1, DIM),
        ln_b=p["ln_b"].reshape(1, DIM),
        text_proj=p["text_proj"],
        token=p["token"],
        w_qk=w_qk,
        mask=jnp.asarray(mask),
    )


# ============================================================================
# Full forward pass: reshape+cast the image, one Pallas kernel. Jitted so the
# per-call host path is a single dispatch.
# ============================================================================
@jax.jit
def custom_clip_forward(image, derived):
    b = image.shape[0]
    x_flat = image.reshape(b, -1).astype(jnp.bfloat16)
    return fused_clip_call(derived, x_flat)                     # (B, n_cls)


# ----------------------------- pure-JAX reference ---------------------------
def reference_forward(image, p):
    b = image.shape[0]
    img_feat = jnp.dot(image.reshape(b, -1).astype(jnp.bfloat16), p["w_img"],
                       preferred_element_type=jnp.float32)
    ctx_e = jnp.broadcast_to(p["ctx"][None], (N_DESC, N_CTX, DIM))
    prompts = jnp.stack([
        jnp.concatenate([p["prefix"][i], ctx_e, p["suffix"][i]], axis=1)
        for i in range(N_CLS)
    ])
    x = prompts + p["pos_emb"][None, None]
    eot_idx = jnp.argmax(p["tokenized"], axis=-1)
    x_eot = x[jnp.arange(N_CLS)[:, None], jnp.arange(N_DESC)[None, :], eot_idx]
    mean = x_eot.mean(-1, keepdims=True)
    var = ((x_eot - mean) ** 2).mean(-1, keepdims=True)
    xn = (x_eot - mean) / jnp.sqrt(var + 1e-5) * p["ln_w"] + p["ln_b"]
    txt = xn @ p["text_proj"]                                   # (C, Nd, D)
    img_n = img_feat / jnp.linalg.norm(img_feat, axis=-1, keepdims=True)
    ls = jnp.exp(p["logit_scale"])
    cols = []
    for i in range(N_CLS):
        v = txt[i]
        q = p["token"][i:i + 1] @ p["wq"].T
        k = v @ p["wk"].T
        attn = jax.nn.softmax((q @ k.T) * DIM ** -0.5, axis=-1)
        out = p["token"][i:i + 1] + attn @ v
        out_n = out / jnp.linalg.norm(out, axis=-1, keepdims=True)
        cols.append(ls * (img_n @ out_n.T))
    return jnp.concatenate(cols, axis=1)


if __name__ == "__main__":
    key = jax.random.PRNGKey(0)
    k_img, k_par = jax.random.split(key)
    image = jax.random.normal(k_img, (B, C, H, W), jnp.float32)  # NCHW
    params = make_params(k_par)
    derived = jax.tree_util.tree_map(jax.block_until_ready, precompute(params))

    logits = jax.block_until_ready(custom_clip_forward(image, derived))
    ref = jax.block_until_ready(reference_forward(image, params))

    assert logits.shape == (B, N_CLS), logits.shape
    np.testing.assert_allclose(np.asarray(logits), np.asarray(ref),
                               rtol=1e-2, atol=1e-2)
    print("KERNEL_OK")
</pallas_src>

<mosaic_0001>
module attributes {stable_mosaic.version = 11 : i64} {
  func.func @_fused_clip_kernel(%arg0: memref<1xf32, #tpu.memory_space<smem>>, %arg1: memref<2x768xbf16, #tpu.memory_space<vmem>>, %arg2: memref<768x32xbf16, #tpu.memory_space<vmem>>, %arg3: memref<12x32xf32, #tpu.memory_space<vmem>>, %arg4: memref<1x32xf32, #tpu.memory_space<vmem>>, %arg5: memref<1x32xf32, #tpu.memory_space<vmem>>, %arg6: memref<32x32xf32, #tpu.memory_space<vmem>>, %arg7: memref<3x32xf32, #tpu.memory_space<vmem>>, %arg8: memref<32x32xf32, #tpu.memory_space<vmem>>, %arg9: memref<3x12xf32, #tpu.memory_space<vmem>>, %arg10: memref<2x3xf32, #tpu.memory_space<vmem>>) attributes {dimension_semantics = [], scalar_prefetch = 0 : i64, scratch_operands = 0 : i64, tpu.core_type = #tpu.core_type<tc>} {
    %c0 = arith.constant 0 : index
    %c0_0 = arith.constant 0 : index
    %0 = vector.load %arg1[%c0, %c0_0] : memref<2x768xbf16, #tpu.memory_space<vmem>>, vector<2x768xbf16>
    %c0_1 = arith.constant 0 : index
    %c0_2 = arith.constant 0 : index
    %1 = vector.load %arg2[%c0_1, %c0_2] : memref<768x32xbf16, #tpu.memory_space<vmem>>, vector<768x32xbf16>
    %cst = arith.constant dense<0.000000e+00> : vector<2x32xf32>
    %2 = tpu.matmul %0, %1, %cst {dimension_numbers = #tpu.dot_dimension_numbers<[1], [0], [0], [1], [0, 0, 1, 1], [], []>} : vector<2x768xbf16>, vector<768x32xbf16>, vector<2x32xf32> -> vector<2x32xf32>
    %c0_3 = arith.constant 0 : index
    %c0_4 = arith.constant 0 : index
    %3 = vector.load %arg3[%c0_3, %c0_4] : memref<12x32xf32, #tpu.memory_space<vmem>>, vector<12x32xf32>
    %cst_5 = arith.constant dense<0.000000e+00> : vector<12xf32>
    %4 = vector.multi_reduction <add>, %3, %cst_5 [1] : vector<12x32xf32> to vector<12xf32>
    %5 = vector.shape_cast %4 : vector<12xf32> to vector<12x1xf32>
    %cst_6 = arith.constant 3.200000e+01 : f32
    %6 = vector.broadcast %cst_6 : f32 to vector<12x1xf32>
    %7 = arith.divf %5, %6 : vector<12x1xf32>
    %8 = vector.broadcast %7 : vector<12x1xf32> to vector<12x32xf32>
    %9 = arith.subf %3, %8 : vector<12x32xf32>
    %10 = arith.mulf %9, %9 : vector<12x32xf32>
    %cst_7 = arith.constant dense<0.000000e+00> : vector<12xf32>
    %11 = vector.multi_reduction <add>, %10, %cst_7 [1] : vector<12x32xf32> to vector<12xf32>
    %12 = vector.shape_cast %11 : vector<12xf32> to vector<12x1xf32>
    %cst_8 = arith.constant 3.200000e+01 : f32
    %13 = vector.broadcast %cst_8 : f32 to vector<12x1xf32>
    %14 = arith.divf %12, %13 : vector<12x1xf32>
    %15 = vector.broadcast %7 : vector<12x1xf32> to vector<12x32xf32>
    %16 = arith.subf %3, %15 : vector<12x32xf32>
    %cst_9 = arith.constant 9.99999974E-6 : f32
    %17 = vector.broadcast %cst_9 : f32 to vector<12x1xf32>
    %18 = arith.addf %14, %17 : vector<12x1xf32>
    %19 = math.rsqrt %18 : vector<12x1xf32>
    %20 = vector.broadcast %19 : vector<12x1xf32> to vector<12x32xf32>
    %21 = arith.mulf %16, %20 : vector<12x32xf32>
    %c0_10 = arith.constant 0 : index
    %c0_11 = arith.constant 0 : index
    %22 = vector.load %arg4[%c0_10, %c0_11] : memref<1x32xf32, #tpu.memory_space<vmem>>, vector<1x32xf32>
    %23 = vector.broadcast %22 : vector<1x32xf32> to vector<12x32xf32>
    %24 = arith.mulf %21, %23 : vector<12x32xf32>
    %c0_12 = arith.constant 0 : index
    %c0_13 = arith.constant 0 : index
    %25 = vector.load %arg5[%c0_12, %c0_13] : memref<1x32xf32, #tpu.memory_space<vmem>>, vector<1x32xf32>
    %26 = vector.broadcast %25 : vector<1x32xf32> to vector<12x32xf32>
    %27 = arith.addf %24, %26 : vector<12x32xf32>
    %c0_14 = arith.constant 0 : index
    %c0_15 = arith.constant 0 : index
    %28 = vector.load %arg6[%c0_14, %c0_15] : memref<32x32xf32, #tpu.memory_space<vmem>>, vector<32x32xf32>
    %cst_16 = arith.constant dense<0.000000e+00> : vector<12x32xf32>
    %29 = tpu.matmul %27, %28, %cst_16 {dimension_numbers = #tpu.dot_dimension_numbers<[1], [0], [0], [1], [0, 0, 1, 1], [], []>} : vector<12x32xf32>, vector<32x32xf32>, vector<12x32xf32> -> vector<12x32xf32>
    %c0_17 = arith.constant 0 : index
    %c0_18 = arith.constant 0 : index
    %30 = vector.load %arg7[%c0_17, %c0_18] : memref<3x32xf32, #tpu.memory_space<vmem>>, vector<3x32xf32>
    %c0_19 = arith.constant 0 : index
    %c0_20 = arith.constant 0 : index
    %31 = vector.load %arg8[%c0_19, %c0_20] : memref<32x32xf32, #tpu.memory_space<vmem>>, vector<32x32xf32>
    %cst_21 = arith.constant dense<0.000000e+00> : vector<3x32xf32>
    %32 = tpu.matmul %30, %31, %cst_21 {dimension_numbers = #tpu.dot_dimension_numbers<[1], [0], [0], [1], [0, 0, 1, 1], [], []>} : vector<3x32xf32>, vector<32x32xf32>, vector<3x32xf32> -> vector<3x32xf32>
    %cst_22 = arith.constant dense<0.000000e+00> : vector<3x12xf32>
    %33 = tpu.matmul %32, %29, %cst_22 {dimension_numbers = #tpu.dot_dimension_numbers<[1], [1], [0], [0], [0, 0, 1, 0], [], []>} : vector<3x32xf32>, vector<12x32xf32>, vector<3x12xf32> -> vector<3x12xf32>
    %c0_23 = arith.constant 0 : index
    %c0_24 = arith.constant 0 : index
    %34 = vector.load %arg9[%c0_23, %c0_24] : memref<3x12xf32, #tpu.memory_space<vmem>>, vector<3x12xf32>
    %35 = arith.addf %33, %34 : vector<3x12xf32>
    %cst_25 = arith.constant dense<0xFF800000> : vector<3xf32>
    %36 = vector.multi_reduction <maximumf>, %35, %cst_25 [1] : vector<3x12xf32> to vector<3xf32>
    %37 = vector.shape_cast %36 : vector<3xf32> to vector<3x1xf32>
    %38 = vector.broadcast %37 : vector<3x1xf32> to vector<3x12xf32>
    %39 = arith.subf %35, %38 : vector<3x12xf32>
    %40 = math.exp %39 : vector<3x12xf32>
    %cst_26 = arith.constant dense<0.000000e+00> : vector<3xf32>
    %41 = vector.multi_reduction <add>, %40, %cst_26 [1] : vector<3x12xf32> to vector<3xf32>
    %42 = vector.shape_cast %41 : vector<3xf32> to vector<3x1xf32>
    %43 = tpu.reciprocal %42 {approx = true} : vector<3x1xf32> -> vector<3x1xf32>
    %44 = vector.broadcast %43 : vector<3x1xf32> to vector<3x12xf32>
    %45 = arith.mulf %40, %44 : vector<3x12xf32>
    %cst_27 = arith.constant dense<0.000000e+00> : vector<3x32xf32>
    %46 = tpu.matmul %45, %29, %cst_27 {dimension_numbers = #tpu.dot_dimension_numbers<[1], [0], [0], [1], [0, 0, 1, 1], [], []>} : vector<3x12xf32>, vector<12x32xf32>, vector<3x32xf32> -> vector<3x32xf32>
    %47 = arith.addf %30, %46 : vector<3x32xf32>
    %48 = arith.mulf %47, %47 : vector<3x32xf32>
    %cst_28 = arith.constant dense<0.000000e+00> : vector<3xf32>
    %49 = vector.multi_reduction <add>, %48, %cst_28 [1] : vector<3x32xf32> to vector<3xf32>
    %50 = vector.shape_cast %49 : vector<3xf32> to vector<3x1xf32>
    %51 = math.rsqrt %50 : vector<3x1xf32>
    %52 = vector.broadcast %51 : vector<3x1xf32> to vector<3x32xf32>
    %53 = arith.mulf %47, %52 : vector<3x32xf32>
    %54 = arith.mulf %2, %2 : vector<2x32xf32>
    %cst_29 = arith.constant dense<0.000000e+00> : vector<2xf32>
    %55 = vector.multi_reduction <add>, %54, %cst_29 [1] : vector<2x32xf32> to vector<2xf32>
    %56 = vector.shape_cast %55 : vector<2xf32> to vector<2x1xf32>
    %57 = math.rsqrt %56 : vector<2x1xf32>
    %58 = vector.broadcast %57 : vector<2x1xf32> to vector<2x32xf32>
    %59 = arith.mulf %2, %58 : vector<2x32xf32>
    %cst_30 = arith.constant dense<0.000000e+00> : vector<2x3xf32>
    %60 = tpu.matmul %59, %53, %cst_30 {dimension_numbers = #tpu.dot_dimension_numbers<[1], [1], [0], [0], [0, 0, 1, 0], [], []>} : vector<2x32xf32>, vector<3x32xf32>, vector<2x3xf32> -> vector<2x3xf32>
    %c0_31 = arith.constant 0 : index
    %61 = memref.load %arg0[%c0_31] : memref<1xf32, #tpu.memory_space<smem>>
    %62 = vector.broadcast %61 : f32 to vector<2x3xf32>
    %63 = arith.mulf %62, %60 : vector<2x3xf32>
    %c0_32 = arith.constant 0 : index
    %c0_33 = arith.constant 0 : index
    %64 = vector.load %arg10[%c0_32, %c0_33] : memref<2x3xf32, #tpu.memory_space<vmem>>, vector<2x3xf32>
    tpu.vector_store %arg10[%c0_32, %c0_33], %63 {strides = array<i32>} : memref<2x3xf32, #tpu.memory_space<vmem>>, vector<2x3xf32>,
    return
  }
}

</mosaic_0001>

<bundles_post_ra>
// kernel: custom_clip_forward.1
= control target key start
LH: loop header
LB: loop body
LE: loop exit
PB: predicated region body
PF: predicated region fallthrough
CT: control target
= control target key end

     0   :  { %vm516_vm0 = vcmask 261120   ;;  %vm520_vm1 = vcmask 257024   ;;  %s1376_s0 = inlined_call_operand.<no memory space> [shape: f32[1], index: 0, kind: input, shape index: {}]   ;;  %s1377_s1 = inlined_call_operand.vmem [shape: bf16[2,768], index: 1, kind: input, shape index: {}]   ;;  %s1378_s2 = inlined_call_operand.vmem [shape: bf16[768,32], index: 2, kind: input, shape index: {}]   ;;  %s1379_s3 = inlined_call_operand.vmem [shape: f32[12,32], index: 3, kind: input, shape index: {}]   ;;  %s1380_s4 = inlined_call_operand.vmem [shape: f32[1,32], index: 4, kind: input, shape index: {}]   ;;  %s1381_s5 = inlined_call_operand.vmem [shape: f32[1,32], index: 5, kind: input, shape index: {}]   ;;  %s1382_s6 = inlined_call_operand.vmem [shape: f32[32,32], index: 6, kind: input, shape index: {}]   ;;  %s1383_s7 = inlined_call_operand.vmem [shape: f32[3,32], index: 7, kind: input, shape index: {}]   ;;  %s1384_s8 = inlined_call_operand.vmem [shape: f32[32,32], index: 8, kind: input, shape index: {}]   ;;  %s1385_s9 = inlined_call_operand.vmem [shape: f32[3,12], index: 9, kind: input, shape index: {}]   ;;  %s1386_s10 = inlined_call_operand.hbm [shape: f32[2,3], index: 10, kind: output, shape index: {}]  }
   0x1   :  { %v1145_v0 = vld [vmem:[%s1379_s3] sm:$0xff]  ;;  %v1000_v1 = vld [vmem:[%s1378_s2 + $0x38] sm:$0xff]  ;;  %v999_v4 = vld [vmem:[%s1378_s2 + $0x30] sm:$0xff] }
   0x2   :  { %v517_v2 = vsel %vm516_vm0, %v1145_v0, 0.0  ;;  %v1008_v3 = vld [vmem:[%s1378_s2 + $0x78] sm:$0xff]  ;;  %436 = vmatpush.bf16.msra.mxu0 %v1000_v1  ;;  %v1007_v5 = vld [vmem:[%s1378_s2 + $0x70] sm:$0xff]  ;;  %v1164_v6 = vld [vmem:[%s1379_s3 + $0x8] sm:$0xf] }
   0x3   :  { %518 = vadd.xlane.f32.xlu0 %v517_v2  ;;  %449 = vmatpush.bf16.msra.mxu1 %v1008_v3  ;;  %v1016_v7 = vld [vmem:[%s1378_s2 + $0xb8] sm:$0xff]  ;;  %v998_v9 = vld [vmem:[%s1378_s2 + $0x28] sm:$0xff]  ;;  %v521_v10 = vsel %vm520_vm1, %v1164_v6, 0.0  ;;  %v1015_v12 = vld [vmem:[%s1378_s2 + $0xb0] sm:$0xff] }
   0x4   :  { %v1024_v8 = vld [vmem:[%s1378_s2 + $0xf8] sm:$0xff]  ;;  %462 = vmatpush.bf16.msra.mxu2 %v1016_v7  ;;  %v1006_v11 = vld [vmem:[%s1378_s2 + $0x68] sm:$0xff]  ;;  %v1023_v13 = vld [vmem:[%s1378_s2 + $0xf0] sm:$0xff] }
   0x5   :  { %475 = vmatpush.bf16.msra.mxu3 %v1024_v8  ;;  %v997_v14 = vld [vmem:[%s1378_s2 + $0x20] sm:$0xff]  ;;  %v1014_v16 = vld [vmem:[%s1378_s2 + $0xa8] sm:$0xff]  ;;  %v996_v18 = vld [vmem:[%s1378_s2 + $0x18] sm:$0xff] }
   0x6   :  { %437 = vmatpush.bf16.msra.mxu0 %v999_v4  ;;  %v1005_v15 = vld [vmem:[%s1378_s2 + $0x60] sm:$0xff]  ;;  %v1022_v17 = vld [vmem:[%s1378_s2 + $0xe8] sm:$0xff]  ;;  %v1004_v20 = vld [vmem:[%s1378_s2 + $0x58] sm:$0xff] }
   0x7   :  { %450 = vmatpush.bf16.msra.mxu1 %v1007_v5  ;;  %v37_v19 = vld [vmem:[%s1377_s1] sm:$0x3f] }
   0x8   :  { %463 = vmatpush.bf16.msra.mxu2 %v1015_v12  ;;  %135 = vst [vmem:[#allocation1] ss:$9 sm:$0xff] %v37_v19  ;;  %v1013_v21 = vld [vmem:[%s1378_s2 + $0xa0] sm:$0xff] }
   0x9   :  { %476 = vmatpush.bf16.msra.mxu3 %v1023_v13 }
   0xa   :  { %438 = vmatpush.bf16.msra.mxu0 %v998_v9 }
   0xb   :  { %522 = vadd.xlane.f32.xlu0 %v521_v10  ;;  %451 = vmatpush.bf16.msra.mxu1 %v1006_v11 }
   0xc   :  { %464 = vmatpush.bf16.msra.mxu2 %v1014_v16 }
   0xe   :  { %439 = vmatpush.bf16.msra.mxu0 %v997_v14 }
   0xf   :  { %452 = vmatpush.bf16.msra.mxu1 %v1005_v15 }
  0x10   :  { %16 = vsyncpa [#allocation4], 0  ;;  %477 = vmatpush.bf16.msra.mxu3 %v1022_v17  ;;  %v1021_v22 = vld [vmem:[%s1378_s2 + $0xe0] sm:$0xff]  ;;  %v995_v23 = vld [vmem:[%s1378_s2 + $0x10] sm:$0xff]  ;;  %465 = vmatpush.bf16.msra.mxu2 %v1013_v21  ;;  %v1085_v56 = vmov 32.0   ;;  %vm729_vm3 = vcmask 254976  }
  0x11   :  { %v1003_v24 = vld [vmem:[%s1378_s2 + $0x50] sm:$0xff]  ;;  %v1012_v25 = vld [vmem:[%s1378_s2 + $0x98] sm:$0xff]  ;;  %v994_v27 = vld [vmem:[%s1378_s2 + $0x8] sm:$0xff]  ;;  %1045 = vrcp.f32 %v1085_v56  ;;  %vm688_vm10 = vcmask 1043456   ;;  %vm672_vm11 = vcmask 92160   ;;  %vm684_vm12 = vcmask 97280  }
  0x12   :  { %440 = vmatpush.bf16.msra.mxu0 %v996_v18  ;;  %v1020_v26 = vld [vmem:[%s1378_s2 + $0xd8] sm:$0xff]  ;;  %v1002_v28 = vld [vmem:[%s1378_s2 + $0x48] sm:$0xff]  ;;  %v1011_v29 = vld [vmem:[%s1378_s2 + $0x90] sm:$0xff]  ;;  %vm713_vm13 = vcmask 256000   ;;  %s1086_s25 = smov [#allocation3]   ;;  %s782_s28 = sshll.u32 %s1386_s10, 4  ;;  %s783_s28 = int_to_ptr.hbm [resolvable:$true] %s782_s28 }
  0x13   :  { %453 = vmatpush.bf16.msra.mxu1 %v1004_v20  ;;  %v1019_v30 = vld [vmem:[%s1378_s2 + $0xd0] sm:$0xff]  ;;  %v993_v31 = vld [vmem:[%s1378_s2] sm:$0xff]  ;;  %v1032_v32 = vld [vmem:[%s1378_s2 + $0x138] sm:$0xff]  ;;  %s780_s26 = sshll.u32 %s1086_s25, 4  ;;  %s781_s26 = int_to_ptr.vmem [resolvable:$true] %s780_s26 }
  0x14   :  { %478 = vmatpush.bf16.msra.mxu3 %v1021_v22  ;;  %466 = vmatpush.bf16.msra.mxu2 %v1012_v25  ;;  %v1001_v33 = vld [vmem:[%s1378_s2 + $0x40] sm:$0xff]  ;;  %v1040_v34 = vld [vmem:[%s1378_s2 + $0x178] sm:$0xff]  ;;  %v1010_v35 = vld [vmem:[%s1378_s2 + $0x88] sm:$0xff] }
  0x15   :  { %v1018_v36 = vld [vmem:[%s1378_s2 + $0xc8] sm:$0xff]  ;;  %v136_v37 = vld [vmem:[#allocation1] sm:$0xff]  ;;  %v1031_v38 = vld [vmem:[%s1378_s2 + $0x130] sm:$0xff] }
  0x16   :  { %441 = vmatpush.bf16.msra.mxu0 %v995_v23  ;;  %v137_v39 = vld [vmem:[#allocation1 + $0x9] sm:$0xff]  ;;  %v1009_v41 = vld [vmem:[%s1378_s2 + $0x80] sm:$0xff]  ;;  %v138_v45 = vld [vmem:[#allocation1 + $0x12] sm:$0xff] }
  0x17   :  { %454 = vmatpush.bf16.msra.mxu1 %v1003_v24  ;;  %v1039_v40 = vld [vmem:[%s1378_s2 + $0x170] sm:$0xff]  ;;  %v1017_v42 = vld [vmem:[%s1378_s2 + $0xc0] sm:$0xff]  ;;  %v1030_v43 = vld [vmem:[%s1378_s2 + $0x128] sm:$0xff]  ;;  %v1046_v60 = vpop.eup %1045 }
  0x18   :  { %479 = vmatpush.bf16.msra.mxu3 %v1020_v26  ;;  %467 = vmatpush.bf16.msra.mxu2 %v1011_v29  ;;  %v1038_v44 = vld [vmem:[%s1378_s2 + $0x168] sm:$0xff]  ;;  %v1029_v46 = vld [vmem:[%s1378_s2 + $0x120] sm:$0xff]  ;;  %v1028_v48 = vld [vmem:[%s1378_s2 + $0x118] sm:$0xff]  ;;  %v525_v61 = vmul.f32 32.0, %v1046_v60  ;;  %vm529_vm2 = vweird.f32 %v1046_v60 }
  0x19   :  { %v1037_v47 = vld [vmem:[%s1378_s2 + $0x160] sm:$0xff]  ;;  %v1036_v49 = vld [vmem:[%s1378_s2 + $0x158] sm:$0xff]  ;;  %v1027_v50 = vld [vmem:[%s1378_s2 + $0x110] sm:$0xff] }
  0x1a   :  { %442 = vmatpush.bf16.msra.mxu0 %v994_v27  ;;  %v1035_v51 = vld [vmem:[%s1378_s2 + $0x150] sm:$0xff]  ;;  %v139_v52 = vld [vmem:[#allocation1 + $0x1b] sm:$0xff]  ;;  %v1026_v53 = vld [vmem:[%s1378_s2 + $0x108] sm:$0xff]  ;;  %v526_v62 = vsub.f32 1.0, %v525_v61 }
  0x1b   :  { %455 = vmatpush.bf16.msra.mxu1 %v1002_v28  ;;  %v1034_v54 = vld [vmem:[%s1378_s2 + $0x148] sm:$0xff]  ;;  %v1025_v55 = vld [vmem:[%s1378_s2 + $0x100] sm:$0xff] }
  0x1c   :  { %480 = vmatpush.bf16.msra.mxu3 %v1019_v30  ;;  %468 = vmatpush.bf16.msra.mxu2 %v1010_v35  ;;  %v1033_v57 = vld [vmem:[%s1378_s2 + $0x140] sm:$0xff]  ;;  %v141_v59 = vld [vmem:[#allocation1 + $0x2d] sm:$0xff]  ;;  %v527_v63 = vmul.f32 %v1046_v60, %v526_v62  ;;  %v584_v30 = vld [vmem:[%s1382_s6 + $0x18] sm:$0xff] }
  0x1d   :  { %v140_v58 = vld [vmem:[#allocation1 + $0x24] sm:$0xff]  ;;  %v618_v35 = vld [vmem:[%s1384_s8 + $0x18] sm:$0xff] }
  0x1e   :  { %443 = vmatpush.bf16.msra.mxu0 %v993_v31  ;;  %v528_v1 = vadd.f32 %v1046_v60, %v527_v63 }
  0x1f   :  { %456 = vmatpush.bf16.msra.mxu1 %v1001_v33  ;;  %v582_v33 = vld [vmem:[%s1382_s6 + $0x8] sm:$0xff] }
  0x20   :  { %481 = vmatpush.bf16.msra.mxu3 %v1018_v36  ;;  %469 = vmatpush.bf16.msra.mxu2 %v1009_v41  ;;  %v530_v2 = vsel %vm529_vm2, %v1046_v60, %v528_v1  ;;  %v615_v41 = vld [vmem:[%s1384_s8] sm:$0xff] }
  0x21   :  { %444 = vmatmul.bf16.vlgmr.msra.gmra.mxu0 %v136_v37 }
  0x22   :  { %488 = vmatpush.bf16.msrb.mxu0 %v1032_v32  ;;  %457 = vmatmul.bf16.vlgmr.msra.gmra.mxu1 %v137_v39  ;;  %v583_v32 = vld [vmem:[%s1382_s6 + $0x10] sm:$0xff] }
  0x23   :  { %501 = vmatpush.bf16.msrb.mxu1 %v1040_v34  ;;  %470 = vmatmul.bf16.vlgmr.msra.gmra.mxu2 %v138_v45  ;;  %v581_v34 = vld [vmem:[%s1382_s6] sm:$0xff]  ;;  %v617_v39 = vld [vmem:[%s1384_s8 + $0x10] sm:$0xff] }
  0x24   :  { %482 = vmatpush.bf16.msra.mxu3 %v1017_v42  ;;  %603 = vmatpush.msrb.mxu2 %v584_v30 }
  0x26   :  { %489 = vmatpush.bf16.msrb.mxu0 %v1031_v38  ;;  %604 = vmatpush.msrb.mxu2 %v583_v32 }
  0x27   :  { %502 = vmatpush.bf16.msrb.mxu1 %v1039_v40  ;;  %483 = vmatmul.bf16.vlgmr.msra.gmra.mxu3 %v139_v52  ;;  %v616_v40 = vld [vmem:[%s1384_s8 + $0x8] sm:$0xff] }
  0x28   :  { %605 = vmatpush.msrb.mxu2 %v582_v33  ;;  %634 = vmatpush.msrb.mxu3 %v618_v35 }
  0x2a   :  { %490 = vmatpush.bf16.msrb.mxu0 %v1030_v43  ;;  %606 = vmatpush.msrb.mxu2 %v581_v34  ;;  %v1346_v43 = vld [vmem:[%s1383_s7] sm:$0x7] }
  0x2b   :  { %503 = vmatpush.bf16.msrb.mxu1 %v1038_v44  ;;  %635 = vmatpush.msrb.mxu3 %v617_v39 }
  0x2d   :  { %636 = vmatpush.msrb.mxu3 %v616_v40 }
  0x2e   :  { %491 = vmatpush.bf16.msrb.mxu0 %v1029_v46 }
  0x2f   :  { %504 = vmatpush.bf16.msrb.mxu1 %v1037_v47  ;;  %637 = vmatpush.msrb.mxu3 %v615_v41 }
  0x32   :  { %492 = vmatpush.bf16.msrb.mxu0 %v1028_v48 }
  0x33   :  { %505 = vmatpush.bf16.msrb.mxu1 %v1036_v49 }
  0x36   :  { %493 = vmatpush.bf16.msrb.mxu0 %v1027_v50 }
  0x37   :  { %506 = vmatpush.bf16.msrb.mxu1 %v1035_v51  ;;  %985 = vmatmul.msk.f32.vlgmr.msrb.gmra.mxu3 %vm516_vm0, %v1346_v43 }
  0x3a   :  { %494 = vmatpush.bf16.msrb.mxu0 %v1026_v53 }
  0x3b   :  { %507 = vmatpush.bf16.msrb.mxu1 %v1034_v54  ;;  %v1043_v54 = vld [vmem:[%s1380_s4] ss:$0 sm:$0xff] }
  0x3e   :  { %495 = vmatpush.bf16.msrb.mxu0 %v1025_v55 }
  0x3f   :  { %508 = vmatpush.bf16.msrb.mxu1 %v1033_v57 }
  0x41   :  { %496 = vmatmul.bf16.vlgmr.msrb.gmra.mxu0 %v140_v58  ;;  %v1044_v58 = vld [vmem:[%s1381_s5] ss:$0 sm:$0xff] }
  0x42   :  { %509 = vmatmul.bf16.vlgmr.msrb.gmra.mxu1 %v141_v59 }
  0x76   :  { %v519_v3 = vpop.xlane.xlu0 %518 }
  0x77   :  { %v531_v4 = vmul.f32 %v530_v2, %v519_v3 }
  0x79   :  { %v1304_v5 = vsub.f32 %v1145_v0, %v531_v4 }
  0x7b   :  { %v535_v7 = vmul.f32 %v1304_v5, %v1304_v5 }
  0x7d   :  { %v537_v8 = vsel %vm516_vm0, %v535_v7, 0.0 }
  0x7e   :  { %538 = vadd.xlane.f32.xlu1 %v537_v8  ;;  %v523_v9 = vpop.xlane.xlu0 %522 }
  0x7f   :  { %v532_v10 = vmul.f32 %v530_v2, %v523_v9  ;;  %v642_v9 = vld [vmem:[%s1385_s9] sm:$0x7] }
  0x81   :  { %v1310_v11 = vsub.f32 %v1164_v6, %v532_v10 }
  0x83   :  { %v536_v12 = vmul.f32 %v1310_v11, %v1310_v11 }
  0x85   :  { %v540_v13 = vsel %vm520_vm1, %v536_v12, 0.0 }
  0x86   :  { %541 = vadd.xlane.f32.xlu1 %v540_v13 }
  0x9e   :  { %v445_v14 = vpop.f32.mrf.mxu0 }
  0x9f   :  { %v458_v0 = vpop.f32.mrf.mxu1 }
  0xa0   :  { %v459_v17 = vadd.f32 %v458_v0, %v445_v14 }
  0xa6   :  { %v447_v15 = vpop.f32.mrf.mxu0  ;;  %v471_v18 = vpop.f32.mrf.mxu2 }
  0xa7   :  { %v460_v16 = vpop.f32.mrf.mxu1  ;;  %v472_v19 = vadd.f32 %v471_v18, %v459_v17 }
  0xaa   :  { %v484_v20 = vpop.f32.mrf.mxu3 }
  0xab   :  { %v485_v21 = vadd.f32 %v484_v20, %v472_v19 }
  0xae   :  { %v473_v25 = vpop.f32.mrf.mxu2 }
  0xb2   :  { %v486_v27 = vpop.f32.mrf.mxu3 }
  0xba   :  { %v639_v8 = vpop.f32.mrf.mxu3 }
  0xbe   :  { %v497_v22 = vpop.f32.mrf.mxu0 }
  0xbf   :  { %v498_v23 = vadd.f32 %v497_v22, %v485_v21  ;;  %v510_v24 = vpop.f32.mrf.mxu1 }
  0xc1   :  { %v1315_v6 = vadd.f32 %v510_v24, %v498_v23 }
  0xc3   :  { %v728_v26 = vmul.f32 %v1315_v6, %v1315_v6 }
  0xc5   :  { %v730_v28 = vsel %vm729_vm3, %v728_v26, 0.0 }
  0xc6   :  { %731 = vadd.xlane.f32.xlu1 %v730_v28  ;;  %v499_v29 = vpop.f32.mrf.mxu0 }
  0xc7   :  { %v512_v31 = vpop.f32.mrf.mxu1 }
  0xf1   :  { %v539_v36 = vpop.xlane.xlu1 %538 }
  0xf2   :  { %v543_v37 = vmul.f32 %v539_v36, %v530_v2 }
  0xf4   :  { %v545_v38 = vadd.f32 1e-05, %v543_v37 }
  0xf6   :  { %1047 = vrsqrt.f32 %v545_v38  ;;  %vm553_vm5 = vweird.f32 %v545_v38 }
  0xf9   :  { %v542_v42 = vpop.xlane.xlu1 %541 }
  0xfa   :  { %v544_v44 = vmul.f32 %v542_v42, %v530_v2  ;;  %v771_v42 = vstv %s1376_s0 }
  0xfc   :  { %v1048_v45 = vpop.eup %1047  ;;  %v546_v46 = vadd.f32 1e-05, %v544_v44 }
  0xfd   :  { %v548_v47 = vmul.f32 %v1048_v45, %v545_v38  ;;  %vm554_vm4 = vweird.f32 %v1048_v45 }
  0xfe   :  { %1049 = vrsqrt.f32 %v546_v46  ;;  %vm555_vm6 = vmor %vm553_vm5, %vm554_vm4  ;;  %vm563_vm8 = vweird.f32 %v546_v46  ;;  %vm773_vm5 = vcmask 17408  }
  0xff   :  { %v549_v48 = vmul.f32 %v1048_v45, %v548_v47 }
 0x101   :  { %v550_v49 = vmul.f32 0.5, %v549_v48 }
 0x103   :  { %v551_v50 = vsub.f32 1.5, %v550_v49 }
 0x104   :  { %v1050_v51 = vpop.eup %1049 }
 0x105   :  { %v552_v52 = vmul.f32 %v1048_v45, %v551_v50  ;;  %v558_v53 = vmul.f32 %v1050_v51, %v546_v46  ;;  %vm564_vm7 = vweird.f32 %v1050_v51 }
 0x106   :  { %vm565_vm9 = vmor %vm563_vm8, %vm564_vm7 }
 0x107   :  { %v556_v55 = vsel %vm555_vm6, %v1048_v45, %v552_v52  ;;  %v559_v56 = vmul.f32 %v1050_v51, %v558_v53 }
 0x108   :  { %v567_v57 = vmul.f32 %v556_v55, %v1304_v5 }
 0x109   :  { %v560_v59 = vmul.f32 0.5, %v559_v56 }
 0x10a   :  { %v573_v60 = vmul.f32 %v1043_v54, %v567_v57 }
 0x10b   :  { %v561_v61 = vsub.f32 1.5, %v560_v59 }
 0x10c   :  { %v579_v62 = vadd.f32 %v1044_v58, %v573_v60 }
 0x10d   :  { %v562_v63 = vmul.f32 %v1050_v51, %v561_v61 }
 0x10e   :  { %983 = vmatmul.msk.f32.vlgmr.msrb.gmra.mxu2 %vm516_vm0, %v579_v62 }
 0x10f   :  { %v566_v1 = vsel %vm565_vm9, %v1050_v51, %v562_v63 }
 0x110   :  { %v568_v2 = vmul.f32 %v566_v1, %v1310_v11 }
 0x112   :  { %v574_v3 = vmul.f32 %v1043_v54, %v568_v2 }
 0x114   :  { %v580_v4 = vadd.f32 %v1044_v58, %v574_v3 }
 0x116   :  { %984 = vmatmul.msk.f32.gmra.mxu2 %vm516_vm0, %v580_v4 }
 0x139   :  { %v732_v24 = vpop.xlane.xlu1 %731 }
 0x13a   :  { %vm739_vm14 = vweird.f32 %v732_v24 }
 0x191   :  { %v608_v5 = vpop.f32.mrf.mxu2 }
 0x199   :  { %v611_v7 = vpop.f32.mrf.mxu2 }
 0x19a   :  { %986 = vmatpush.xpose.msk.msra.mxu3 %vm516_vm0, %v611_v7  ;;  %989 = vmatpush.msk.msra.mxu2 %vm688_vm10, %v611_v7 }
 0x19c   :  { %706 = vmatpush.msra.mxu2 %v608_v5 }
 0x19e   :  { %987 = vmatpush.xpose.msk.msra.mxu3 %vm516_vm0, %v608_v5 }
 0x1a1   :  { %988 = vmatmul.msk.f32.vlgmr.msra.gmra.mxu3 %vm516_vm0, %v639_v8 }
 0x224   :  { %v669_v10 = vpop.f32.mrf.mxu3 }
 0x225   :  { %v670_v11 = vadd.f32 %v669_v10, %v642_v9 }
 0x227   :  { %v673_v12 = vsel %vm672_vm11, %v670_v11, -inf }
 0x228   :  { %674 = vmax.xlane.f32.xlu2 %v673_v12 }
 0x29b   :  { %v675_v13 = vpop.xlane.xlu2 %674 }
 0x29c   :  { %v676_v14 = vsub.f32 %v670_v11, %v675_v13 }
 0x29e   :  { %v677_v0 = vmul.f32 1.442695, %v676_v14 }
 0x2a0   :  { %1051 = vpow2.f32 %v677_v0 }
 0x2a6   :  { %v1052_v15 = vpop.eup %1051 }
 0x2a7   :  { %v679_v16 = vsel %vm672_vm11, %v1052_v15, 0.0 }
 0x2a8   :  { %680 = vadd.xlane.f32.xlu2 %v679_v16 }
 0x31b   :  { %v681_v17 = vpop.xlane.xlu2 %680 }
 0x31c   :  { %1053 = vrcp.f32 %v681_v17 }
 0x31d   :  { %1055 = vrsqrt.f32 %v732_v24 }
 0x322   :  { %v1054_v18 = vpop.eup %1053 }
 0x323   :  { %v683_v19 = vmul.f32 %v1054_v18, %v1052_v15  ;;  %v1056_v25 = vpop.eup %1055 }
 0x324   :  { %v734_v26 = vmul.f32 %v1056_v25, %v732_v24  ;;  %vm740_vm15 = vweird.f32 %v1056_v25 }
 0x325   :  { %990 = vmatmul.msk.f32.vlgmr.msra.gmra.mxu2 %vm684_vm12, %v683_v19  ;;  %vm741_vm2 = vmor %vm739_vm14, %vm740_vm15 }
 0x326   :  { %v735_v28 = vmul.f32 %v1056_v25, %v734_v26 }
 0x328   :  { %v736_v30 = vmul.f32 0.5, %v735_v28 }
 0x32a   :  { %v737_v33 = vsub.f32 1.5, %v736_v30 }
 0x32c   :  { %v738_v36 = vmul.f32 %v1056_v25, %v737_v33 }
 0x32e   :  { %v742_v39 = vsel %vm741_vm2, %v1056_v25, %v738_v36 }
 0x32f   :  { %v743_v41 = vmul.f32 %v742_v39, %v1315_v6 }
 0x3a8   :  { %v708_v20 = vpop.f32.mrf.mxu2 }
 0x3a9   :  { %v711_v21 = vadd.f32 %v708_v20, %v1346_v43 }
 0x3ab   :  { %v712_v22 = vmul.f32 %v711_v21, %v711_v21 }
 0x3ad   :  { %v714_v23 = vsel %vm713_vm13, %v712_v22, 0.0 }
 0x3ae   :  { %715 = vadd.xlane.f32.xlu0 %v714_v23 }
 0x421   :  { %v716_v27 = vpop.xlane.xlu0 %715 }
 0x422   :  { %1057 = vrsqrt.f32 %v716_v27  ;;  %vm723_vm3 = vweird.f32 %v716_v27 }
 0x428   :  { %v1058_v29 = vpop.eup %1057 }
 0x429   :  { %v718_v31 = vmul.f32 %v1058_v29, %v716_v27  ;;  %vm724_vm1 = vweird.f32 %v1058_v29 }
 0x42a   :  { %vm725_vm4 = vmor %vm723_vm3, %vm724_vm1 }
 0x42b   :  { %v719_v32 = vmul.f32 %v1058_v29, %v718_v31 }
 0x42d   :  { %v720_v34 = vmul.f32 0.5, %v719_v32 }
 0x42f   :  { %v721_v35 = vsub.f32 1.5, %v720_v34 }
 0x431   :  { %v722_v37 = vmul.f32 %v1058_v29, %v721_v35 }
 0x433   :  { %v726_v38 = vsel %vm725_vm4, %v1058_v29, %v722_v37 }
 0x434   :  { %v727_v40 = vmul.f32 %v726_v38, %v711_v21 }
 0x436   :  { %991 = vmatpush.xpose.msk.msrb.mxu3 %vm516_vm0, %v727_v40 }
 0x439   :  { %992 = vmatmul.msk.f32.vlgmr.msrb.gmra.mxu3 %vm516_vm0, %v743_v41 }
 0x4bc   :  { %v767_v43 = vpop.f32.mrf.mxu3 }
 0x4bd   :  { %v772_v44 = vmul.f32 %v771_v42, %v767_v43 }
 0x4bf   :  { %774 = vst.msk [vmem:[#allocation3] sm:$0x3] %vm773_vm5, %v772_v44 }
 0x4c0   :  { %785 = dma.vmem_to_hbm [thread:$0]  %s781_s26, 32, %s783_s28, [#allocation4]  }
 0x4c1   :  { %1083 = dma.done.wait [#allocation4], 32  }
 0x4c2   :  { %1084 = vsyncadd [#allocation4], 4294967264 }
 0x4c3   :  { %790 = vsyncpa [#allocation4], 1 }

</bundles_post_ra>
